<compile_context>
chip_gen: v7x
topology: tpu7x:2x2x1
jax: 0.10.0
libtpu: 0.0.40
codegen_flags: <defaults>
</compile_context>

<pallas_src>
import jax
import jax.numpy as jnp
from jax.experimental import pallas as pl
from jax.experimental.pallas import tpu as pltpu


def fused_bn_relu_conv_kernel(xm_ref, xh_ref, scale_ref, shift_ref, w_ref, o_ref):
    # xm_ref:    (1, 2*TR, Wo, 2C) f32 -- raw input rows [2*r*TR, 2*(r+1)*TR) of
    #            batch n, packed-pair view (even/odd input cols stacked on the
    #            channel axis).
    # xh_ref:    (1, 2, Wo, 2C) f32 -- the two raw input rows just above the
    #            main block; only its LAST row is used (kh=0 tap of the tile's
    #            first output row).  Zeroed in-kernel when r == 0 (top padding).
    # scale_ref: (1, 2C) f32, shift_ref: (1, 2C) f32 -- BatchNorm folded to a
    #            per-channel affine, tiled x2 for the packed-pair channel axis.
    # w_ref:     (9C, Cp) bf16 -- conv weights, tap-major / channel-minor,
    #            C_out zero-padded to lane-dense Cp.
    # o_ref:     (1, TR*Wo, Cp) f32 -- output rows [r*TR, (r+1)*TR) of batch n.
    r = pl.program_id(1)
    _, two_tr, wo, c2 = xm_ref.shape
    tr = two_tr // 2
    c = c2 // 2
    m = tr * wo

    scale = scale_ref[...]                       # (1, 2C)
    shift = shift_ref[...]

    # BN affine + ReLU (f32 VPU), then a SINGLE cast to bf16 (MXU operand dtype).
    am = jnp.maximum(xm_ref[0] * scale + shift, 0.0).astype(jnp.bfloat16)   # (2TR, Wo, 2C)
    ah = jnp.maximum(xh_ref[0] * scale + shift, 0.0).astype(jnp.bfloat16)   # (2,   Wo, 2C)
    # The conv's zero padding applies to the BN+ReLU OUTPUT: for the first row
    # tile the "row above" is padding, not data.
    ah = ah[1:2] * (r > 0).astype(jnp.bfloat16)                             # (1, Wo, 2C)

    # Column taps in the packed-pair view:
    #   kw=1 -> even input cols  = channels [0, C)
    #   kw=2 -> odd  input cols  = channels [C, 2C)
    #   kw=0 -> odd cols of the previous output col; zero at ow=0 (left padding)
    def col_taps(a):                              # a: (rows, Wo, 2C) bf16
        a_c1 = a[..., :c]
        a_c2 = a[..., c:]
        if wo > 1:
            a_c0 = jnp.concatenate(
                [jnp.zeros((a.shape[0], 1, c), jnp.bfloat16), a_c2[:, :wo - 1, :]],
                axis=1)
        else:
            a_c0 = jnp.zeros_like(a_c2)
        return (a_c0, a_c1, a_c2)

    am_c = col_taps(am)                           # each (2TR, Wo, C)
    ah_c = col_taps(ah)                           # each (1,   Wo, C)

    # Row taps: kh=1 -> even rows, kh=2 -> odd rows, kh=0 -> odd rows shifted up
    # by one output row (first row supplied by the halo).  Concatenating all
    # nine (TR, Wo, C) windows along the channel axis gives ONE K=9C matmul.
    taps = []
    for kh in range(3):
        for kw in range(3):
            a_kw = am_c[kw].reshape(tr, 2, wo, c)
            if kh == 1:
                t = a_kw[:, 0]                    # even rows
            elif kh == 2:
                t = a_kw[:, 1]                    # odd rows
            elif tr > 1:                          # kh == 0
                t = jnp.concatenate([ah_c[kw], a_kw[:tr - 1, 1]], axis=0)
            else:
                t = ah_c[kw]
            taps.append(t)                        # (TR, Wo, C)
    a_mat = jnp.concatenate(taps, axis=-1).reshape(m, 9 * c)   # (M, 9C) bf16

    # Single MXU matmul, f32 accumulation, lane-dense store.
    o_ref[0] = jnp.dot(a_mat, w_ref[...], preferred_element_type=jnp.float32)


def _pick_tile_rows(Ho, Wo, C, Cp):
    """Largest output-row tile whose per-step live VMEM fits ~10 MiB, capped at
    32 rows (enough grid steps to pipeline), keeping TR*Wo sublane-aligned (or
    TR == Ho, where the block equals the full array dimension)."""
    budget = 10 * 1024 * 1024

    def est_bytes(tr):
        # dbl-buffered f32 input (32*C) + bf16 acts/col-variants/taps/A (~56*C)
        # + f32 accumulator and dbl-buffered output (12*Cp), per output element.
        return tr * Wo * (88 * C + 12 * Cp)

    divisors = [d for d in range(1, Ho + 1) if Ho % d == 0]
    aligned = [d for d in divisors if (d * Wo) % 8 == 0 or d == Ho]
    good = [d for d in aligned if d <= 32 and est_bytes(d) <= budget]
    if good:
        return max(good)
    fits = [d for d in aligned if est_bytes(d) <= budget]
    return max(fits) if fits else min(aligned)


def down_transition_forward(x_nchw, gamma, beta, conv_w, eps=1e-5):
    N, C, H, W = x_nchw.shape
    Cout, Cin, KH, KW = conv_w.shape
    assert Cin == C and KH == 3 and KW == 3
    # Stride-2 downsample: even H, W confines the conv's zero padding to the top
    # row / left column (no bottom/right padding needed).
    assert H % 2 == 0 and W % 2 == 0, "kernel assumes even H, W"

    Ho, Wo = H // 2, W // 2
    C2 = 2 * C
    Cp = ((Cout + 127) // 128) * 128              # lane-dense output channels

    x = jnp.transpose(x_nchw, (0, 2, 3, 1)).astype(jnp.float32)   # NHWC

    # --- Training-mode BatchNorm2d batch stats (biased variance), centered
    # two-pass for numerical stability.  Running-stat updates don't affect the
    # forward output and are omitted.
    mean = jnp.mean(x, axis=(0, 1, 2))
    var = jnp.mean(jnp.square(x - mean), axis=(0, 1, 2))
    scale = gamma.astype(jnp.float32) * jax.lax.rsqrt(var + eps)
    shift = beta.astype(jnp.float32) - mean * scale
    scale2 = jnp.tile(scale, 2).reshape(1, C2)    # packed-pair channel axis
    shift2 = jnp.tile(shift, 2).reshape(1, C2)

    # Packed-pair view: (N,H,W,C) -> (N,H,Wo,2C) is a FREE row-major reshape
    # (no HBM staging); channels [0,C) = even input columns, [C,2C) = odd.
    x2 = x.reshape(N, H, Wo, C2)

    # Conv weights (Cout,Cin,3,3) -> single (9*Cin, Cp) bf16 matrix,
    # tap-major / channel-minor, Cout zero-padded to lane-dense Cp.
    w_mat = jnp.transpose(conv_w.astype(jnp.float32), (2, 3, 1, 0)).reshape(9 * Cin, Cout)
    w_mat = jnp.pad(w_mat, ((0, 0), (0, Cp - Cout))).astype(jnp.bfloat16)

    TR = _pick_tile_rows(Ho, Wo, C, Cp)
    n_row_tiles = Ho // TR

    out = pl.pallas_call(
        fused_bn_relu_conv_kernel,
        out_shape=jax.ShapeDtypeStruct((N, Ho * Wo, Cp), jnp.float32),
        grid=(N, n_row_tiles),
        in_specs=[
            # main block: raw input rows [2*r*TR, 2*(r+1)*TR) of batch n
            pl.BlockSpec((1, 2 * TR, Wo, C2), lambda n, r: (n, r, 0, 0)),
            # halo block: the two raw input rows just above (clamped at the top;
            # the r==0 case is zeroed in-kernel as the conv's top padding)
            pl.BlockSpec((1, 2, Wo, C2),
                         lambda n, r: (n, jnp.maximum(r * TR - 1, 0), 0, 0)),
            pl.BlockSpec((1, C2), lambda n, r: (0, 0)),        # BN scale (resident)
            pl.BlockSpec((1, C2), lambda n, r: (0, 0)),        # BN shift (resident)
            pl.BlockSpec((9 * Cin, Cp), lambda n, r: (0, 0)),  # weights  (resident)
        ],
        out_specs=pl.BlockSpec((1, TR * Wo, Cp), lambda n, r: (n, r, 0)),
        compiler_params=pltpu.CompilerParams(
            dimension_semantics=("parallel", "parallel"),
            vmem_limit_bytes=48 * 1024 * 1024),
    )(x2, x2, scale2, shift2, w_mat)

    # TODO(synk): for tiny Cout (<<128) this lane-padded f32 writeback plus the
    # XLA slice/transpose is an extra HBM pass; fuse into the consumer if needed.
    out = out[:, :, :Cout].reshape(N, Ho, Wo, Cout)
    return jnp.transpose(out, (0, 3, 1, 2))       # back to NCHW


if __name__ == "__main__":
    key = jax.random.PRNGKey(0)
    k1, k2, k3, k4 = jax.random.split(key, 4)

    N, C, H, W = 2, 8, 16, 16
    x = jax.random.normal(k1, (N, C, H, W), jnp.float32)
    # deterministic synthetic parameters (shapes from __init__):
    gamma = 1.0 + 0.1 * jax.random.normal(k2, (C,), jnp.float32)            # bn.weight
    beta = 0.1 * jax.random.normal(k3, (C,), jnp.float32)                   # bn.bias
    conv_w = jax.random.normal(k4, (C, C, 3, 3), jnp.float32) / (9 * C) ** 0.5  # conv.weight

    fwd = jax.jit(down_transition_forward)
    out = jax.block_until_ready(fwd(x, gamma, beta, conv_w))
    assert out.shape == (N, C, H // 2, W // 2)

    # pure-JAX f32 reference for sanity
    x_nhwc = jnp.transpose(x, (0, 2, 3, 1))
    mean = jnp.mean(x_nhwc, axis=(0, 1, 2))
    var = jnp.mean((x_nhwc - mean) ** 2, axis=(0, 1, 2))
    act_ref = jnp.maximum((x_nhwc - mean) / jnp.sqrt(var + 1e-5) * gamma + beta, 0.0)
    ref = jax.lax.conv_general_dilated(
        jnp.transpose(act_ref, (0, 3, 1, 2)), conv_w,
        window_strides=(2, 2), padding=((1, 1), (1, 1)),
        dimension_numbers=("NCHW", "OIHW", "NCHW"))
    # bf16 MXU operands (f32 accumulation) -> slightly loosened tolerance vs f32 ref
    assert jnp.allclose(out, ref, atol=2e-2, rtol=2e-2), "mismatch vs JAX reference"

    print("KERNEL_OK")
</pallas_src>

<mosaic_0001>
module attributes {stable_mosaic.version = 11 : i64} {
  func.func @fused_bn_relu_conv_kernel(%arg0: i32, %arg1: i32, %arg2: memref<1x16x8x16xf32, #tpu.memory_space<vmem>>, %arg3: memref<1x2x8x16xf32, #tpu.memory_space<vmem>>, %arg4: memref<1x16xf32, #tpu.memory_space<vmem>>, %arg5: memref<1x16xf32, #tpu.memory_space<vmem>>, %arg6: memref<72x128xbf16, #tpu.memory_space<vmem>>, %arg7: memref<1x64x128xf32, #tpu.memory_space<vmem>>) attributes {dimension_semantics = [#tpu.dimension_semantics<parallel>, #tpu.dimension_semantics<parallel>], iteration_bounds = array<i64: 2, 1>, scalar_prefetch = 0 : i64, scratch_operands = 0 : i64, tpu.core_type = #tpu.core_type<tc>, window_params = [{transform_indices = @transform_0, window_bounds = array<i64: 1, 16, 8, 16>}, {transform_indices = @transform_1, window_bounds = array<i64: 1, 2, 8, 16>}, {pipeline_mode = #tpu.pipeline_mode<synchronous>, transform_indices = @transform_2, window_bounds = array<i64: 1, 16>}, {pipeline_mode = #tpu.pipeline_mode<synchronous>, transform_indices = @transform_3, window_bounds = array<i64: 1, 16>}, {pipeline_mode = #tpu.pipeline_mode<synchronous>, transform_indices = @transform_4, window_bounds = array<i64: 72, 128>}, {transform_indices = @transform_5, window_bounds = array<i64: 1, 64, 128>}]} {
    %c0 = arith.constant 0 : index
    %c0_0 = arith.constant 0 : index
    %0 = vector.load %arg4[%c0, %c0_0] : memref<1x16xf32, #tpu.memory_space<vmem>>, vector<1x16xf32>
    %c0_1 = arith.constant 0 : index
    %c0_2 = arith.constant 0 : index
    %1 = vector.load %arg5[%c0_1, %c0_2] : memref<1x16xf32, #tpu.memory_space<vmem>>, vector<1x16xf32>
    %c0_3 = arith.constant 0 : index
    %c0_4 = arith.constant 0 : index
    %c0_5 = arith.constant 0 : index
    %c0_6 = arith.constant 0 : index
    %2 = vector.load %arg2[%c0_3, %c0_4, %c0_5, %c0_6] : memref<1x16x8x16xf32, #tpu.memory_space<vmem>>, vector<1x16x8x16xf32>
    %3 = vector.shape_cast %2 : vector<1x16x8x16xf32> to vector<16x8x16xf32>
    %4 = vector.shape_cast %0 : vector<1x16xf32> to vector<1x1x16xf32>
    %5 = vector.broadcast %4 : vector<1x1x16xf32> to vector<16x8x16xf32>
    %6 = arith.mulf %3, %5 : vector<16x8x16xf32>
    %7 = vector.shape_cast %1 : vector<1x16xf32> to vector<1x1x16xf32>
    %8 = vector.broadcast %7 : vector<1x1x16xf32> to vector<16x8x16xf32>
    %9 = arith.addf %6, %8 : vector<16x8x16xf32>
    %cst = arith.constant 0.000000e+00 : f32
    %10 = vector.broadcast %cst : f32 to vector<16x8x16xf32>
    %11 = arith.maximumf %9, %10 : vector<16x8x16xf32>
    %12 = arith.truncf %11 : vector<16x8x16xf32> to vector<16x8x16xbf16>
    %c0_7 = arith.constant 0 : index
    %c0_8 = arith.constant 0 : index
    %c0_9 = arith.constant 0 : index
    %c0_10 = arith.constant 0 : index
    %13 = vector.load %arg3[%c0_7, %c0_8, %c0_9, %c0_10] : memref<1x2x8x16xf32, #tpu.memory_space<vmem>>, vector<1x2x8x16xf32>
    %14 = vector.shape_cast %13 : vector<1x2x8x16xf32> to vector<2x8x16xf32>
    %15 = vector.shape_cast %0 : vector<1x16xf32> to vector<1x1x16xf32>
    %16 = vector.broadcast %15 : vector<1x1x16xf32> to vector<2x8x16xf32>
    %17 = arith.mulf %14, %16 : vector<2x8x16xf32>
    %18 = vector.shape_cast %1 : vector<1x16xf32> to vector<1x1x16xf32>
    %19 = vector.broadcast %18 : vector<1x1x16xf32> to vector<2x8x16xf32>
    %20 = arith.addf %17, %19 : vector<2x8x16xf32>
    %cst_11 = arith.constant 0.000000e+00 : f32
    %21 = vector.broadcast %cst_11 : f32 to vector<2x8x16xf32>
    %22 = arith.maximumf %20, %21 : vector<2x8x16xf32>
    %23 = arith.truncf %22 : vector<2x8x16xf32> to vector<2x8x16xbf16>
    %24 = vector.extract_strided_slice %23 {offsets = [1, 0, 0], sizes = [1, 8, 16], strides = [1, 1, 1]} : vector<2x8x16xbf16> to vector<1x8x16xbf16>
    %c0_i32 = arith.constant 0 : i32
    %25 = arith.cmpi sgt, %arg1, %c0_i32 : i32
    %26 = arith.extui %25 : i1 to i32
    %27 = arith.sitofp %26 : i32 to f32
    %28 = arith.truncf %27 : f32 to bf16
    %29 = vector.broadcast %28 : bf16 to vector<1x8x16xbf16>
    %30 = arith.mulf %24, %29 : vector<1x8x16xbf16>
    %31 = vector.extract_strided_slice %12 {offsets = [0, 0, 0], sizes = [16, 8, 8], strides = [1, 1, 1]} : vector<16x8x16xbf16> to vector<16x8x8xbf16>
    %32 = vector.extract_strided_slice %12 {offsets = [0, 0, 8], sizes = [16, 8, 8], strides = [1, 1, 1]} : vector<16x8x16xbf16> to vector<16x8x8xbf16>
    %cst_12 = arith.constant 0.000000e+00 : bf16
    %33 = vector.broadcast %cst_12 : bf16 to vector<16x1x8xbf16>
    %34 = vector.extract_strided_slice %32 {offsets = [0, 0, 0], sizes = [16, 7, 8], strides = [1, 1, 1]} : vector<16x8x8xbf16> to vector<16x7x8xbf16>
    %35 = tpu.concatenate %33, %34 in 1 : vector<16x1x8xbf16>, vector<16x7x8xbf16> -> vector<16x8x8xbf16>
    %36 = vector.extract_strided_slice %30 {offsets = [0, 0, 0], sizes = [1, 8, 8], strides = [1, 1, 1]} : vector<1x8x16xbf16> to vector<1x8x8xbf16>
    %37 = vector.extract_strided_slice %30 {offsets = [0, 0, 8], sizes = [1, 8, 8], strides = [1, 1, 1]} : vector<1x8x16xbf16> to vector<1x8x8xbf16>
    %cst_13 = arith.constant 0.000000e+00 : bf16
    %38 = vector.broadcast %cst_13 : bf16 to vector<1x1x8xbf16>
    %39 = vector.extract_strided_slice %37 {offsets = [0, 0, 0], sizes = [1, 7, 8], strides = [1, 1, 1]} : vector<1x8x8xbf16> to vector<1x7x8xbf16>
    %40 = tpu.concatenate %38, %39 in 1 : vector<1x1x8xbf16>, vector<1x7x8xbf16> -> vector<1x8x8xbf16>
    %41 = vector.shape_cast %35 : vector<16x8x8xbf16> to vector<8x2x8x8xbf16>
    %42 = vector.extract_strided_slice %41 {offsets = [0, 1, 0, 0], sizes = [7, 1, 8, 8], strides = [1, 1, 1, 1]} : vector<8x2x8x8xbf16> to vector<7x1x8x8xbf16>
    %43 = vector.shape_cast %42 : vector<7x1x8x8xbf16> to vector<7x8x8xbf16>
    %44 = tpu.concatenate %40, %43 in 0 : vector<1x8x8xbf16>, vector<7x8x8xbf16> -> vector<8x8x8xbf16>
    %45 = vector.shape_cast %31 : vector<16x8x8xbf16> to vector<8x2x8x8xbf16>
    %46 = vector.extract_strided_slice %45 {offsets = [0, 1, 0, 0], sizes = [7, 1, 8, 8], strides = [1, 1, 1, 1]} : vector<8x2x8x8xbf16> to vector<7x1x8x8xbf16>
    %47 = vector.shape_cast %46 : vector<7x1x8x8xbf16> to vector<7x8x8xbf16>
    %48 = tpu.concatenate %36, %47 in 0 : vector<1x8x8xbf16>, vector<7x8x8xbf16> -> vector<8x8x8xbf16>
    %49 = vector.shape_cast %32 : vector<16x8x8xbf16> to vector<8x2x8x8xbf16>
    %50 = vector.extract_strided_slice %49 {offsets = [0, 1, 0, 0], sizes = [7, 1, 8, 8], strides = [1, 1, 1, 1]} : vector<8x2x8x8xbf16> to vector<7x1x8x8xbf16>
    %51 = vector.shape_cast %50 : vector<7x1x8x8xbf16> to vector<7x8x8xbf16>
    %52 = tpu.concatenate %37, %51 in 0 : vector<1x8x8xbf16>, vector<7x8x8xbf16> -> vector<8x8x8xbf16>
    %53 = vector.shape_cast %35 : vector<16x8x8xbf16> to vector<8x2x8x8xbf16>
    %54 = vector.extract_strided_slice %53 {offsets = [0, 0, 0, 0], sizes = [8, 1, 8, 8], strides = [1, 1, 1, 1]} : vector<8x2x8x8xbf16> to vector<8x1x8x8xbf16>
    %55 = vector.shape_cast %54 : vector<8x1x8x8xbf16> to vector<8x8x8xbf16>
    %56 = vector.shape_cast %31 : vector<16x8x8xbf16> to vector<8x2x8x8xbf16>
    %57 = vector.extract_strided_slice %56 {offsets = [0, 0, 0, 0], sizes = [8, 1, 8, 8], strides = [1, 1, 1, 1]} : vector<8x2x8x8xbf16> to vector<8x1x8x8xbf16>
    %58 = vector.shape_cast %57 : vector<8x1x8x8xbf16> to vector<8x8x8xbf16>
    %59 = vector.shape_cast %32 : vector<16x8x8xbf16> to vector<8x2x8x8xbf16>
    %60 = vector.extract_strided_slice %59 {offsets = [0, 0, 0, 0], sizes = [8, 1, 8, 8], strides = [1, 1, 1, 1]} : vector<8x2x8x8xbf16> to vector<8x1x8x8xbf16>
    %61 = vector.shape_cast %60 : vector<8x1x8x8xbf16> to vector<8x8x8xbf16>
    %62 = vector.shape_cast %35 : vector<16x8x8xbf16> to vector<8x2x8x8xbf16>
    %63 = vector.extract_strided_slice %62 {offsets = [0, 1, 0, 0], sizes = [8, 1, 8, 8], strides = [1, 1, 1, 1]} : vector<8x2x8x8xbf16> to vector<8x1x8x8xbf16>
    %64 = vector.shape_cast %63 : vector<8x1x8x8xbf16> to vector<8x8x8xbf16>
    %65 = vector.shape_cast %31 : vector<16x8x8xbf16> to vector<8x2x8x8xbf16>
    %66 = vector.extract_strided_slice %65 {offsets = [0, 1, 0, 0], sizes = [8, 1, 8, 8], strides = [1, 1, 1, 1]} : vector<8x2x8x8xbf16> to vector<8x1x8x8xbf16>
    %67 = vector.shape_cast %66 : vector<8x1x8x8xbf16> to vector<8x8x8xbf16>
    %68 = vector.shape_cast %32 : vector<16x8x8xbf16> to vector<8x2x8x8xbf16>
    %69 = vector.extract_strided_slice %68 {offsets = [0, 1, 0, 0], sizes = [8, 1, 8, 8], strides = [1, 1, 1, 1]} : vector<8x2x8x8xbf16> to vector<8x1x8x8xbf16>
    %70 = vector.shape_cast %69 : vector<8x1x8x8xbf16> to vector<8x8x8xbf16>
    %71 = tpu.concatenate %44, %48, %52, %55, %58, %61, %64, %67, %70 in 2 : vector<8x8x8xbf16>, vector<8x8x8xbf16>, vector<8x8x8xbf16>, vector<8x8x8xbf16>, vector<8x8x8xbf16>, vector<8x8x8xbf16>, vector<8x8x8xbf16>, vector<8x8x8xbf16>, vector<8x8x8xbf16> -> vector<8x8x72xbf16>
    %72 = vector.shape_cast %71 : vector<8x8x72xbf16> to vector<64x72xbf16>
    %c0_14 = arith.constant 0 : index
    %c0_15 = arith.constant 0 : index
    %73 = vector.load %arg6[%c0_14, %c0_15] : memref<72x128xbf16, #tpu.memory_space<vmem>>, vector<72x128xbf16>
    %cst_16 = arith.constant dense<0.000000e+00> : vector<64x128xf32>
    %74 = tpu.matmul %72, %73, %cst_16 {dimension_numbers = #tpu.dot_dimension_numbers<[1], [0], [0], [1], [0, 0, 1, 1], [], []>} : vector<64x72xbf16>, vector<72x128xbf16>, vector<64x128xf32> -> vector<64x128xf32>
    %c0_17 = arith.constant 0 : index
    %c0_18 = arith.constant 0 : index
    %c0_19 = arith.constant 0 : index
    %75 = vector.load %arg7[%c0_17, %c0_18, %c0_19] : memref<1x64x128xf32, #tpu.memory_space<vmem>>, vector<1x64x128xf32>
    %76 = vector.shape_cast %75 : vector<1x64x128xf32> to vector<64x128xf32>
    %77 = vector.shape_cast %74 : vector<64x128xf32> to vector<1x64x128xf32>
    tpu.vector_store %arg7[%c0_17, %c0_18, %c0_19], %77 {strides = array<i32>} : memref<1x64x128xf32, #tpu.memory_space<vmem>>, vector<1x64x128xf32>,
    return
  }
  func.func @transform_0(%arg0: i32, %arg1: i32) -> (i32, i32, i32, i32) {
    %c0_i32 = arith.constant 0 : i32
    %c0_i32_0 = arith.constant 0 : i32
    %c0_i32_1 = arith.constant 0 : i32
    return %arg0, %arg1, %c0_i32, %c0_i32_0 : i32, i32, i32, i32
  }
  func.func @transform_1(%arg0: i32, %arg1: i32) -> (i32, i32, i32, i32) {
    %c8_i32 = arith.constant 8 : i32
    %0 = arith.muli %arg1, %c8_i32 : i32
    %c1_i32 = arith.constant 1 : i32
    %1 = arith.subi %0, %c1_i32 : i32
    %c0_i32 = arith.constant 0 : i32
    %2 = arith.maxsi %1, %c0_i32 : i32
    %c0_i32_0 = arith.constant 0 : i32
    %c0_i32_1 = arith.constant 0 : i32
    %c0_i32_2 = arith.constant 0 : i32
    return %arg0, %2, %c0_i32_0, %c0_i32_1 : i32, i32, i32, i32
  }
  func.func @transform_2(%arg0: i32, %arg1: i32) -> (i32, i32) {
    %c0_i32 = arith.constant 0 : i32
    %c0_i32_0 = arith.constant 0 : i32
    %c0_i32_1 = arith.constant 0 : i32
    return %c0_i32, %c0_i32_0 : i32, i32
  }
  func.func @transform_3(%arg0: i32, %arg1: i32) -> (i32, i32) {
    %c0_i32 = arith.constant 0 : i32
    %c0_i32_0 = arith.constant 0 : i32
    %c0_i32_1 = arith.constant 0 : i32
    return %c0_i32, %c0_i32_0 : i32, i32
  }
  func.func @transform_4(%arg0: i32, %arg1: i32) -> (i32, i32) {
    %c0_i32 = arith.constant 0 : i32
    %c0_i32_0 = arith.constant 0 : i32
    %c0_i32_1 = arith.constant 0 : i32
    return %c0_i32, %c0_i32_0 : i32, i32
  }
  func.func @transform_5(%arg0: i32, %arg1: i32) -> (i32, i32, i32) {
    %c0_i32 = arith.constant 0 : i32
    %c0_i32_0 = arith.constant 0 : i32
    return %arg0, %arg1, %c0_i32 : i32, i32, i32
  }
}

</mosaic_0001>

<bundles_post_ra>
// kernel: tile.13
= control target key start
LH: loop header
LB: loop body
LE: loop exit
PB: predicated region body
PF: predicated region fallthrough
CT: control target
= control target key end

     0   :  { %s22_s0 = inlined_call_operand.vmem [shape: f32[8], index: 0, kind: input, shape index: {}]   ;;  %s23_s1 = inlined_call_operand.vmem [shape: f32[2,8], index: 1, kind: output, shape index: {}]  }
   0x1   :  { %v4_v0 = vld [vmem:[%s22_s0] ss:$0 sm:$0xff] }
   0x2   :  { %5 = vst [vmem:[%s23_s1] sm:$0x3] %v4_v0 }

// kernel: tile.14
= control target key start
LH: loop header
LB: loop body
LE: loop exit
PB: predicated region body
PF: predicated region fallthrough
CT: control target
= control target key end

     0   :  { %vm7_vm0 = vcmask 64512   ;;  %vm13_vm1 = vcmask 130112   ;;  %s39_s0 = inlined_call_operand.vmem [shape: f32[2,8], index: 0, kind: input, shape index: {}]   ;;  %s40_s1 = inlined_call_operand.vmem [shape: f32[1,16], index: 1, kind: output, shape index: {}]  }
   0x1   :  { %v4_v0 = vld [vmem:[%s39_s0] sm:$0x3]  ;;  %s22_s0 = smov 8  }
   0x2   :  { %5 = vst [vmem:[#allocation1] sm:$0x3] %v4_v0 }
   0x9   :  { %v10_v1 = vld [vmem:[#allocation1 + $0x1] sm:$0x1]   ;;  %v6_v2 = vld [vmem:[#allocation1] sm:$0x1]  }
   0xa   :  { %11 = vrot.lane.b32.xlu0 %v10_v1, %s22_s0  ;;  %8 = vst.msk [vmem:[#allocation0] sm:$0x1] %vm7_vm0, %v6_v2  }
  0x7c   :  { %v12_v3 = vpop.permute.xlu0 %11  }
  0x7d   :  { %14 = vst.msk [vmem:[#allocation0] sm:$0x1] %vm13_vm1, %v12_v3  }
  0x84   :  { %v18_v4 = vld [vmem:[#allocation0] sm:$0x1] }
  0x85   :  { %20 = vst [vmem:[%s40_s1] sm:$0x1] %v18_v4 }

// kernel: down_transition_forward.1
= control target key start
LH: loop header
LB: loop body
LE: loop exit
PB: predicated region body
PF: predicated region fallthrough
CT: control target
= control target key end

     0   :  { %s1285_s18 = smov 0   ;;  %s1287_s19 = smov 0   ;;  %s1700_s0 = inlined_call_operand.vmem [shape: f32[2,16,8,16], index: 0, kind: input, shape index: {}, may-alias: {0,1}]   ;;  %s1701_s1 = inlined_call_operand.vmem [shape: f32[2,16,8,16], index: 1, kind: input, shape index: {}, may-alias: {0,1}]   ;;  %s1702_s2 = inlined_call_operand.vmem [shape: f32[1,16], index: 2, kind: input, shape index: {}]   ;;  %s1703_s3 = inlined_call_operand.vmem [shape: f32[1,16], index: 3, kind: input, shape index: {}]   ;;  %s1704_s4 = inlined_call_operand.vmem [shape: bf16[72,128], index: 4, kind: input, shape index: {}]   ;;  %s1705_s5 = inlined_call_operand.vmem [shape: f32[2,64,128], index: 5, kind: output, shape index: {}]  }
   0x1   :  { %s1289_s20 = smov 0  }
   0x2 LB: > { %s27_s21 = sadd.s32 1, %s1243_s19  ;;  %p1124_p0 = scmp.ge.s32.totalorder %s1247_s20, 1  ;;  %s1247_s20 = sphi %s1289_s20, %s15_s20   ;;  %s1243_s19 = sphi %s1287_s19, %s1709_s19   ;;  %s1239_s18 = sphi %s1285_s18, %s1708_s18  }
   0x3   : > { %p29_p1 = scmp.ge.s32.totalorder %s27_s21, 2  ;;  %p241_p2 = scmp.lt.s32.totalorder %s1247_s20, 3 }
   0x5   : > { %s1711_s21 = smov (%p29_p1, %s27_s21), 0  ;;  %p242_p3 = pnand %p1124_p0, %p241_p2 }
   0x6   : > { %p291_p4 = scmp.lt.s32.totalorder (!%p242_p3), %s1239_s18, 1  ;;  %v1308_v0 = vld [vmem:[%s1702_s2] ss:$0 sm:$0xff] (!%p242_p3)  ;;  %s1249_s30 = smov (!%p242_p3), 120   ;;  %vm606_vm0 = vcmask (!%p242_p3), 1040384   ;;  %vm938_vm3 = vcmask (!%p242_p3), 1043456  }
   0x7   : > { %245 = sbr.rel (%p242_p3) target bundleno = 520 (0x208), region = 40  ;;  %v1314_v1 = vld [vmem:[%s1703_s3] ss:$0 sm:$0xff] (!%p242_p3)  ;;  %s1250_s9 = smov (!%p242_p3), 8   ;;  %vm607_vm1 = vsmask.f32 (!%p242_p3), 256 }
   0x8   : > { %s1251_s10 = smov (!%p242_p3), 32   ;;  %s1252_s11 = smov (!%p242_p3), 56   ;;  %vm1486_vm2 = vmand (!%p242_p3), %vm606_vm0, %vm607_vm1  ;;  %vm749_vm4 = vcmask (!%p242_p3), 64512   ;;  %vm783_vm5 = vcmask (!%p242_p3), 195584   ;;  %vm774_vm6 = vcmask (!%p242_p3), 130048   ;;  %vm800_vm7 = vcmask (!%p242_p3), 261120  }
   0x9   : > { %s1253_s14 = smov (!%p242_p3), 24   ;;  %s1254_s27 = smov (!%p242_p3), 48   ;;  %vm817_vm8 = vcmask (!%p242_p3), 326656   ;;  %vm826_vm9 = vcmask (!%p242_p3), 392192   ;;  %vm843_vm10 = vcmask (!%p242_p3), 457728   ;;  %vm860_vm11 = vcmask (!%p242_p3), 523264  }
   0xa   : > { %vm925_vm12 = vcmask (!%p242_p3), 588800  }
   0xe   : > { %s1713_s18 = smov (!%p291_p4, %s1239_s18), 1 }
   0xf   : > { %s1148_s24 = sshll.u32 %s1713_s18, 7  ;;  %s1150_s28 = sshll.u32 %s1713_s18, 6 }
  0x10   : > { %s1321_s29 = scalar_lea.vmem %s1700_s0, %s1148_s24  ;;  %s312_s8 = scalar_lea.vmem %s1701_s1, %s1148_s24 }
  0x11   : > { %v339_v2 = vld [vmem:[%s1321_s29 + $0x40] sm:$0xff]  ;;  %v341_v4 = vld [vmem:[%s1321_s29 + $0x50] sm:$0xff]  ;;  %v334_v55 = vld [vmem:[%s1321_s29 + $0x18] sm:$0xff]  ;;  %s326_s6 = scalar_lea.vmem %s1705_s5, %s1150_s28 }
  0x12   : > { %v331_v3 = vld [vmem:[%s1321_s29] sm:$0xff]  ;;  %v361_v5 = vmul.f32 %v1308_v0, %v339_v2  ;;  %v363_v7 = vmul.f32 %v1308_v0, %v341_v4  ;;  %v333_v8 = vld [vmem:[%s1321_s29 + $0x10] sm:$0xff]  ;;  %v332_v60 = vld [vmem:[%s1321_s29 + $0x8] sm:$0xff] }
  0x13   : > { %v353_v6 = vmul.f32 %v1308_v0, %v331_v3  ;;  %v337_v9 = vld [vmem:[%s1321_s29 + $0x30] sm:$0xff]  ;;  %v335_v10 = vld [vmem:[%s1321_s29 + $0x20] sm:$0xff]  ;;  %v355_v11 = vmul.f32 %v1308_v0, %v333_v8  ;;  %v342_v3 = vld [vmem:[%s1321_s29 + $0x58] sm:$0xff]  ;;  %v356_v8 = vmul.f32 %v1308_v0, %v334_v55 }
  0x14   : > { %v359_v12 = vmul.f32 %v1308_v0, %v337_v9  ;;  %v357_v13 = vmul.f32 %v1308_v0, %v335_v10  ;;  %v345_v14 = vld [vmem:[%s1321_s29 + $0x70] sm:$0xff]  ;;  %v343_v15 = vld [vmem:[%s1321_s29 + $0x60] sm:$0xff]  ;;  %v383_v16 = vadd.f32 %v1314_v1, %v361_v5  ;;  %v385_v18 = vadd.f32 %v1314_v1, %v363_v7  ;;  %v340_v4 = vld [vmem:[%s1321_s29 + $0x48] sm:$0xff] }
  0x15   : > { %v375_v17 = vadd.f32 %v1314_v1, %v353_v6  ;;  %v367_v19 = vmul.f32 %v1308_v0, %v345_v14  ;;  %v377_v20 = vadd.f32 %v1314_v1, %v355_v11  ;;  %v365_v23 = vmul.f32 %v1308_v0, %v343_v15  ;;  %v338_v9 = vld [vmem:[%s1321_s29 + $0x38] sm:$0xff]  ;;  %v336_v10 = vld [vmem:[%s1321_s29 + $0x28] sm:$0xff] }
  0x16   : > { %v381_v21 = vadd.f32 %v1314_v1, %v359_v12  ;;  %v379_v22 = vadd.f32 %v1314_v1, %v357_v13  ;;  %v399_v24 = vmax.f32 %v383_v16, 0.0  ;;  %v401_v26 = vmax.f32 %v385_v18, 0.0 }
  0x17   : > { %v391_v25 = vmax.f32 %v375_v17, 0.0  ;;  %v389_v27 = vadd.f32 %v1314_v1, %v367_v19  ;;  %v393_v28 = vmax.f32 %v377_v20, 0.0  ;;  %v387_v31 = vadd.f32 %v1314_v1, %v365_v23 }
  0x18   : > { %v397_v29 = vmax.f32 %v381_v21, 0.0  ;;  %v395_v30 = vmax.f32 %v379_v22, 0.0  ;;  %v1347_v32 = vpack.c.bf16 %v399_v24, %v399_v24  ;;  %v1351_v34 = vpack.c.bf16 %v401_v26, %v401_v26 }
  0x19   : > { %v1349_v33 = vpack.c.bf16 %v391_v25, %v391_v25  ;;  %v405_v35 = vmax.f32 %v389_v27, 0.0  ;;  %v1353_v36 = vpack.c.bf16 %v393_v28, %v393_v28  ;;  %v403_v39 = vmax.f32 %v387_v31, 0.0  ;;  %v346_v27 = vld [vmem:[%s1321_s29 + $0x78] sm:$0xff] }
  0x1a   : > { %v1355_v37 = vpack.c.bf16 %v397_v29, %v397_v29  ;;  %v1357_v38 = vpack.c.bf16 %v395_v30, %v395_v30  ;;  %v503_v40 = vshrl.u32 %v1347_v32, 16  ;;  %v506_v41 = vshll.u32 %v1347_v32, 16 }
  0x1b   : > { %v447_v42 = vshrl.u32 %v1349_v33, 16  ;;  %v450_v43 = vshll.u32 %v1349_v33, 16  ;;  %v517_v44 = vshrl.u32 %v1351_v34, 16  ;;  %v520_v45 = vshll.u32 %v1351_v34, 16 }
  0x1c   : > { %v461_v46 = vshrl.u32 %v1353_v36, 16  ;;  %v464_v47 = vshll.u32 %v1353_v36, 16  ;;  %v505_v48 = vrot.slane %v503_v40, 7  ;;  %v489_v50 = vshrl.u32 %v1355_v37, 16 }
  0x1d   : > { %v449_v49 = vrot.slane %v447_v42, 7  ;;  %v492_v51 = vshll.u32 %v1355_v37, 16  ;;  %v519_v52 = vrot.slane %v517_v44, 7  ;;  %v475_v54 = vshrl.u32 %v1357_v38, 16 }
  0x1e   : > { %v463_v53 = vrot.slane %v461_v46, 7  ;;  %v508_v56 = vor.u32 %v506_v41, %v505_v48  ;;  %v491_v58 = vrot.slane %v489_v50, 7  ;;  %v1371_v59 = vpack.c.bf16 %v405_v35, %v405_v35  ;;  %v344_v46 = vld [vmem:[%s1321_s29 + $0x68] sm:$0xff] }
  0x1f   : > { %v452_v57 = vor.u32 %v450_v43, %v449_v49  ;;  %v522_v61 = vor.u32 %v520_v45, %v519_v52  ;;  %v478_v63 = vshll.u32 %v1357_v38, 16  ;;  %v1375_v2 = vpack.c.bf16 %v403_v39, %v403_v39 }
  0x20   : > { %v466_v62 = vor.u32 %v464_v47, %v463_v53  ;;  %574 = vrot.lane.b32.xlu1 %v508_v56, %s1249_s30  ;;  %v494_v5 = vor.u32 %v492_v51, %v491_v58  ;;  %v477_v6 = vrot.slane %v475_v54, 7  ;;  %v545_v7 = vshrl.u32 %v1371_v59, 16 }
  0x21   : > { %558 = vrot.lane.b32.xlu0 %v452_v57, %s1249_s30  ;;  %v548_v11 = vshll.u32 %v1371_v59, 16  ;;  %v531_v12 = vshrl.u32 %v1375_v2, 16  ;;  %v534_v13 = vshll.u32 %v1375_v2, 16  ;;  %v354_v14 = vmul.f32 %v1308_v0, %v332_v60 }
  0x22   : > { %v547_v15 = vrot.slane %v545_v7, 7  ;;  %v378_v16 = vadd.f32 %v1314_v1, %v356_v8  ;;  %v364_v17 = vmul.f32 %v1308_v0, %v342_v3  ;;  %v362_v18 = vmul.f32 %v1308_v0, %v340_v4  ;;  %v423_v7 = vld [vmem:[%s312_s8 + $0x8] sm:$0xff] }
  0x23   : > { %v533_v19 = vrot.slane %v531_v12, 7  ;;  %v376_v20 = vadd.f32 %v1314_v1, %v354_v14  ;;  %v360_v21 = vmul.f32 %v1308_v0, %v338_v9  ;;  %v358_v22 = vmul.f32 %v1308_v0, %v336_v10 }
  0x24   : > { %578 = vrot.lane.b32.xlu1 %v522_v61, %s1249_s30  ;;  %v480_v23 = vor.u32 %v478_v63, %v477_v6  ;;  %v394_v24 = vmax.f32 %v378_v16, 0.0  ;;  %v386_v25 = vadd.f32 %v1314_v1, %v364_v17  ;;  %v384_v26 = vadd.f32 %v1314_v1, %v362_v18 }
  0x25   : > { %562 = vrot.lane.b32.xlu0 %v466_v62, %s1249_s30  ;;  %v550_v28 = vor.u32 %v548_v11, %v547_v15  ;;  %v392_v29 = vmax.f32 %v376_v20, 0.0  ;;  %v382_v30 = vadd.f32 %v1314_v1, %v360_v21  ;;  %v380_v31 = vadd.f32 %v1314_v1, %v358_v22 }
  0x26   : > { %v536_v35 = vor.u32 %v534_v13, %v533_v19  ;;  %v1402_v39 = vpack.c.bf16 %v394_v24, %v394_v24  ;;  %v402_v40 = vmax.f32 %v386_v25, 0.0  ;;  %v400_v41 = vmax.f32 %v384_v26, 0.0 }
  0x27   : > { %v1404_v42 = vpack.c.bf16 %v392_v29, %v392_v29  ;;  %v398_v43 = vmax.f32 %v382_v30, 0.0  ;;  %v396_v44 = vmax.f32 %v380_v31, 0.0  ;;  %v368_v45 = vmul.f32 %v1308_v0, %v346_v27 }
  0x28   : > { %570 = vrot.lane.b32.xlu1 %v494_v5, %s1249_s30  ;;  %v468_v47 = vshrl.u32 %v1402_v39, 16  ;;  %v471_v48 = vshll.u32 %v1402_v39, 16  ;;  %v1412_v49 = vpack.c.bf16 %v402_v40, %v402_v40  ;;  %v1414_v50 = vpack.c.bf16 %v400_v41, %v400_v41 }
  0x29   : > { %566 = vrot.lane.b32.xlu0 %v480_v23, %s1249_s30  ;;  %v454_v51 = vshrl.u32 %v1404_v42, 16  ;;  %v457_v52 = vshll.u32 %v1404_v42, 16  ;;  %v1418_v53 = vpack.c.bf16 %v398_v43, %v398_v43  ;;  %v1420_v54 = vpack.c.bf16 %v396_v44, %v396_v44 }
  0x2a   : > { %v470_v55 = vrot.slane %v468_v47, 7  ;;  %v524_v56 = vshrl.u32 %v1412_v49, 16  ;;  %v510_v57 = vshrl.u32 %v1414_v50, 16  ;;  %v366_v58 = vmul.f32 %v1308_v0, %v344_v46 }
  0x2b   : > { %v456_v60 = vrot.slane %v454_v51, 7  ;;  %v527_v61 = vshll.u32 %v1412_v49, 16  ;;  %v513_v62 = vshll.u32 %v1414_v50, 16  ;;  %v496_v63 = vshrl.u32 %v1418_v53, 16 }
  0x2c   : > { %586 = vrot.lane.b32.xlu1 %v550_v28, %s1249_s30  ;;  %v473_v3 = vor.u32 %v471_v48, %v470_v55  ;;  %v526_v4 = vrot.slane %v524_v56, 7  ;;  %v512_v5 = vrot.slane %v510_v57, 7  ;;  %v482_v6 = vshrl.u32 %v1420_v54, 16 }
  0x2d   : > { %582 = vrot.lane.b32.xlu0 %v536_v35, %s1249_s30  ;;  %v459_v8 = vor.u32 %v457_v52, %v456_v60  ;;  %v390_v9 = vadd.f32 %v1314_v1, %v368_v45  ;;  %v499_v10 = vshll.u32 %v1418_v53, 16  ;;  %v388_v11 = vadd.f32 %v1314_v1, %v366_v58  ;;  %v1224_v60 = vld [vmem:[%s1704_s4 + $0x20] ss:$0 sps:$4 sm:$0xff]  }
  0x2e   : > { %v498_v12 = vrot.slane %v496_v63, 7  ;;  %v485_v13 = vshll.u32 %v1420_v54, 16  ;;  %v424_v15 = vmul.f32 %v1308_v0, %v423_v7  ;;  %v529_v16 = vor.u32 %v527_v61, %v526_v4 }
  0x2f   : > { %v406_v14 = vmax.f32 %v390_v9, 0.0  ;;  %v515_v17 = vor.u32 %v513_v62, %v512_v5  ;;  %v484_v18 = vrot.slane %v482_v6, 7  ;;  %v404_v19 = vmax.f32 %v388_v11, 0.0 }
  0x30   : > { %564 = vrot.lane.b32.xlu1 %v473_v3, %s1249_s30  ;;  %v425_v21 = vadd.f32 %v1314_v1, %v424_v15  ;;  %v501_v23 = vor.u32 %v499_v10, %v498_v12  ;;  %v940_v62 = vsel %vm938_vm3, %v1224_v60, 0 }
  0x31   : > { %560 = vrot.lane.b32.xlu0 %v459_v8, %s1249_s30  ;;  %v1443_v20 = vpack.c.bf16 %v406_v14, %v406_v14  ;;  %v1446_v22 = vpack.c.bf16 %v404_v19, %v404_v19  ;;  %v487_v0 = vor.u32 %v485_v13, %v484_v18 }
  0x32   : > { %v426_v25 = vmax.f32 %v425_v21, 0.0 }
  0x33   : > { %v552_v24 = vshrl.u32 %v1443_v20, 16  ;;  %v555_v26 = vshll.u32 %v1443_v20, 16  ;;  %v538_v27 = vshrl.u32 %v1446_v22, 16  ;;  %v541_v28 = vshll.u32 %v1446_v22, 16 }
  0x34   : > { %580 = vrot.lane.b32.xlu1 %v529_v16, %s1249_s30  ;;  %v427_v30 = vpack.c.bf16 %v426_v25, %v426_v25 }
  0x35   : > { %576 = vrot.lane.b32.xlu0 %v515_v17, %s1249_s30  ;;  %v554_v29 = vrot.slane %v552_v24, 7  ;;  %v540_v1 = vrot.slane %v538_v27, 7 }
  0x36   : > { %v445_v31 = vmul.bf16 0.0, %v427_v30 }
  0x37   : > { %v557_v35 = vor.u32 %v555_v26, %v554_v29  ;;  %v543_v40 = vor.u32 %v541_v28, %v540_v1 }
  0x38   : > { %572 = vrot.lane.b32.xlu1 %v501_v23, %s1249_s30  ;;  %v626_v41 = vshrl.u32 %v445_v31, 16  ;;  %v629_v43 = vshll.u32 %v445_v31, 16 }
  0x39   : > { %568 = vrot.lane.b32.xlu0 %v487_v0, %s1249_s30 }
  0x3a   : > { %v628_v44 = vrot.slane %v626_v41, 7 }
  0x3c   : > { %588 = vrot.lane.b32.xlu1 %v557_v35, %s1249_s30  ;;  %v631_v45 = vor.u32 %v629_v43, %v628_v44 }
  0x3d   : > { %584 = vrot.lane.b32.xlu0 %v543_v40, %s1249_s30 }
  0x40   : > { %644 = vrot.lane.b32.xlu1 %v445_v31, %s1250_s9 }
  0x41   : > { %632 = vrot.lane.b32.xlu0 %v631_v45, %s1249_s30 }
  0x44   : > { %652 = vrot.lane.b32.xlu1 %v1418_v53, %s1250_s9 }
  0x45   : > { %646 = vrot.lane.b32.xlu0 %v1404_v42, %s1250_s9 }
  0x48   : > { %648 = vrot.lane.b32.xlu1 %v1402_v39, %s1250_s9 }
  0x49   : > { %654 = vrot.lane.b32.xlu0 %v1414_v50, %s1250_s9 }
  0x4c   : > { %656 = vrot.lane.b32.xlu1 %v1412_v49, %s1250_s9 }
  0x4d   : > { %650 = vrot.lane.b32.xlu0 %v1420_v54, %s1250_s9 }
  0x50   : > { %692 = vrot.lane.b32.xlu1 %v1349_v33, %s1251_s10 }
  0x51   : > { %658 = vrot.lane.b32.xlu0 %v1446_v22, %s1250_s9 }
  0x54   : > { %700 = vrot.lane.b32.xlu1 %v1347_v32, %s1251_s10 }
  0x55   : > { %694 = vrot.lane.b32.xlu0 %v1353_v36, %s1251_s10  ;;  %v1220_v36 = vld [vmem:[%s1704_s4] sm:$0xff]  }
  0x56   : > { %1160 = vmatprep.subr.bf16.mxu0 %v1220_v36  ;;  %1178 = vmatprep.subr.bf16.mxu1 %v1220_v36 }
  0x57   : > { %1161 = vmatpush3.bf16.msra.mxu0 %v1220_v36  ;;  %1183 = vmatpush3.bf16.msra.mxu1 %v1220_v36 }
  0x58   : > { %696 = vrot.lane.b32.xlu1 %v1357_v38, %s1251_s10 }
  0x59   : > { %702 = vrot.lane.b32.xlu0 %v1351_v34, %s1251_s10 }
  0x5c   : > { %704 = vrot.lane.b32.xlu1 %v1375_v2, %s1251_s10 }
  0x5d   : > { %698 = vrot.lane.b32.xlu0 %v1355_v37, %s1251_s10 }
  0x60   : > { %733 = vrot.lane.b32.xlu1 %v1404_v42, %s1252_s11 }
  0x61   : > { %706 = vrot.lane.b32.xlu0 %v1371_v59, %s1251_s10 }
  0x64   : > { %741 = vrot.lane.b32.xlu1 %v1414_v50, %s1252_s11 }
  0x65   : > { %735 = vrot.lane.b32.xlu0 %v1402_v39, %s1252_s11  ;;  %v1221_v39 = vld [vmem:[%s1704_s4 + $0x8] sm:$0xff]  }
  0x66   : > { %1162 = vmatprep.subr.bf16.mxu0 %v1221_v39  ;;  %1179 = vmatprep.subr.bf16.mxu1 %v1221_v39 }
  0x67   : > { %1163 = vmatpush3.bf16.msra.mxu0 %v1221_v39  ;;  %1184 = vmatpush3.bf16.msra.mxu1 %v1221_v39 }
  0x68   : > { %737 = vrot.lane.b32.xlu1 %v1420_v54, %s1252_s11  ;;  %v1223_v54 = vld [vmem:[%s1704_s4 + $0x18] sm:$0xff]  }
  0x69   : > { %743 = vrot.lane.b32.xlu0 %v1412_v49, %s1252_s11  ;;  %v1222_v49 = vld [vmem:[%s1704_s4 + $0x10] sm:$0xff]  }
  0x6a   : > { %1164 = vmatprep.subr.bf16.mxu0 %v1222_v49  ;;  %1180 = vmatprep.subr.bf16.mxu1 %v1222_v49 }
  0x6b   : > { %1165 = vmatpush3.bf16.msra.mxu0 %v1222_v49  ;;  %1185 = vmatpush3.bf16.msra.mxu1 %v1222_v49 }
  0x6c   : > { %1166 = vmatprep.subr.bf16.mxu0 %v1223_v54  ;;  %1181 = vmatprep.subr.bf16.mxu1 %v1223_v54 }
  0x6d   : > { %739 = vrot.lane.b32.xlu0 %v1418_v53, %s1252_s11 }
  0x6f   : > { %1167 = vmatpush3.bf16.msra.mxu0 %v1223_v54  ;;  %1186 = vmatpush3.bf16.msra.mxu1 %v1223_v54 }
  0x70   : > { %1188 = vmatprep.subr.msk.bf16.mxu0 %vm938_vm3, %v1224_v60  ;;  %1189 = vmatprep.subr.msk.bf16.mxu1 %vm938_vm3, %v1224_v60 }
  0x73   : > { %1169 = vmatpush3.bf16.msra.mxu0 %v940_v62  ;;  %1187 = vmatpush3.bf16.msra.mxu1 %v940_v62 }
  0x92   : > { %v575_v33 = vpop.permute.xlu1 %574 }
  0x93   : > { %v559_v34 = vpop.permute.xlu0 %558  ;;  %v617_v38 = vsel %vm1486_vm2, 0, %v575_v33 }
  0x94   : > { %v609_v37 = vsel %vm1486_vm2, 0, %v559_v34 }
  0x95   : > { %668 = vrot.lane.b32.xlu1 %v609_v37, %s1253_s14 }
  0x96   : > { %v579_v59 = vpop.permute.xlu1 %578 }
  0x97   : > { %v563_v2 = vpop.permute.xlu0 %562  ;;  %v619_v46 = vsel %vm1486_vm2, 0, %v579_v59 }
  0x98   : > { %v611_v42 = vsel %vm1486_vm2, 0, %v563_v2 }
  0x99   : > { %676 = vrot.lane.b32.xlu1 %v617_v38, %s1253_s14  ;;  %670 = vrot.lane.b32.xlu0 %v611_v42, %s1253_s14 }
  0x9a   : > { %v571_v47 = vpop.permute.xlu1 %570 }
  0x9b   : > { %v567_v48 = vpop.permute.xlu0 %566  ;;  %v615_v51 = vsel %vm1486_vm2, 0, %v571_v47 }
  0x9c   : > { %v613_v50 = vsel %vm1486_vm2, 0, %v567_v48 }
  0x9d   : > { %678 = vrot.lane.b32.xlu0 %v619_v46, %s1253_s14  ;;  %672 = vrot.lane.b32.xlu1 %v613_v50, %s1253_s14 }
  0x9e   : > { %v587_v52 = vpop.permute.xlu1 %586 }
  0x9f   : > { %v583_v53 = vpop.permute.xlu0 %582  ;;  %v623_v56 = vsel %vm1486_vm2, 0, %v587_v52 }
  0xa0   : > { %v621_v55 = vsel %vm1486_vm2, 0, %v583_v53 }
  0xa1   : > { %674 = vrot.lane.b32.xlu0 %v615_v51, %s1253_s14  ;;  %680 = vrot.lane.b32.xlu1 %v621_v55, %s1253_s14 }
  0xa2   : > { %v565_v57 = vpop.permute.xlu1 %564 }
  0xa3   : > { %v561_v58 = vpop.permute.xlu0 %560  ;;  %v1536_v63 = vsel %vm1486_vm2, 0, %v565_v57 }
  0xa4   : > { %v1530_v61 = vsel %vm1486_vm2, 0, %v561_v58 }
  0xa5   : > { %682 = vrot.lane.b32.xlu0 %v623_v56, %s1253_s14  ;;  %716 = vrot.lane.b32.xlu1 %v1530_v61, %s1254_s27 }
  0xa6   : > { %v581_v3 = vpop.permute.xlu1 %580 }
  0xa7   : > { %v577_v4 = vpop.permute.xlu0 %576  ;;  %v1546_v6 = vsel %vm1486_vm2, 0, %v581_v3 }
  0xa8   : > { %v1540_v5 = vsel %vm1486_vm2, 0, %v577_v4 }
  0xa9   : > { %718 = vrot.lane.b32.xlu0 %v1536_v63, %s1254_s27  ;;  %724 = vrot.lane.b32.xlu1 %v1540_v5, %s1254_s27 }
  0xaa   : > { %v573_v7 = vpop.permute.xlu1 %572 }
  0xab   : > { %v569_v8 = vpop.permute.xlu0 %568  ;;  %v616_v10 = vsel %vm1486_vm2, 0, %v573_v7 }
  0xac   : > { %v1550_v9 = vsel %vm1486_vm2, 0, %v569_v8 }
  0xad   : > { %726 = vrot.lane.b32.xlu0 %v1546_v6, %s1254_s27  ;;  %720 = vrot.lane.b32.xlu1 %v1550_v9, %s1254_s27 }
  0xae   : > { %v589_v13 = vpop.permute.xlu1 %588 }
  0xaf   : > { %v585_v11 = vpop.permute.xlu0 %584  ;;  %v624_v14 = vsel %vm1486_vm2, 0, %v589_v13 }
  0xb0   : > { %v1558_v12 = vsel %vm1486_vm2, 0, %v585_v11 }
  0xb1   : > { %722 = vrot.lane.b32.xlu0 %v616_v10, %s1254_s27  ;;  %728 = vrot.lane.b32.xlu1 %v1558_v12, %s1254_s27 }
  0xb2   : > { %v645_v16 = vpop.permute.xlu1 %644 }
  0xb3   : > { %v633_v15 = vpop.permute.xlu0 %632 }
  0xb4   : > { %v635_v45 = vsel %vm1486_vm2, 0, %v633_v15 }
  0xb5   : > { %730 = vrot.lane.b32.xlu0 %v624_v14, %s1254_s27  ;;  %745 = vrot.lane.b32.xlu1 %v1446_v22, %s1252_s11  ;;  %v752_v36 = vsel %vm749_vm4, %v635_v45, %v645_v16 }
  0xb6   : > { %v653_v18 = vpop.permute.xlu1 %652  ;;  %v775_v2 = vsel %vm774_vm6, %v752_v36, %v645_v16 }
  0xb7   : > { %v647_v17 = vpop.permute.xlu0 %646  ;;  %v764_v59 = vsel %vm749_vm4, %v616_v10, %v653_v18 }
  0xb8   : > { %v755_v39 = vsel %vm749_vm4, %v1530_v61, %v647_v17  ;;  %v779_v42 = vsel %vm774_vm6, %v764_v59, %v653_v18 }
  0xb9   : > { %747 = vrot.lane.b32.xlu0 %v1443_v20, %s1252_s11  ;;  %v776_v48 = vsel %vm774_vm6, %v755_v39, %v647_v17 }
  0xba   : > { %v649_v21 = vpop.permute.xlu1 %648 }
  0xbb   : > { %v655_v19 = vpop.permute.xlu0 %654  ;;  %v758_v49 = vsel %vm749_vm4, %v1536_v63, %v649_v21 }
  0xbc   : > { %v767_v50 = vsel %vm749_vm4, %v1540_v5, %v655_v19  ;;  %v777_v54 = vsel %vm774_vm6, %v758_v49, %v649_v21 }
  0xbd   : > { %v780_v55 = vsel %vm774_vm6, %v767_v50, %v655_v19 }
  0xbe   : > { %v1567_v24 = vpop.permute.xlu1 %656 }
  0xbf   : > { %v651_v23 = vpop.permute.xlu0 %650  ;;  %v770_v19 = vsel %vm749_vm4, %v1546_v6, %v1567_v24 }
  0xc0   : > { %v761_v60 = vsel %vm749_vm4, %v1550_v9, %v651_v23 }
  0xc1   : > { %v778_v5 = vsel %vm774_vm6, %v761_v60, %v651_v23 }
  0xc2   : > { %v693_v0 = vpop.permute.xlu1 %692 }
  0xc3   : > { %v1569_v25 = vpop.permute.xlu0 %658 }
  0xc4   : > { %v773_v6 = vsel %vm749_vm4, %v1558_v12, %v1569_v25 }
  0xc6   : > { %v701_v27 = vpop.permute.xlu1 %700 }
  0xc7   : > { %v695_v26 = vpop.permute.xlu0 %694 }
  0xca   : > { %v1573_v22 = vpop.permute.xlu1 %696 }
  0xcb   : > { %v1571_v28 = vpop.permute.xlu0 %702 }
  0xce   : > { %v1577_v20 = vpop.permute.xlu1 %704 }
  0xcf   : > { %v1575_v29 = vpop.permute.xlu0 %698 }
  0xd2   : > { %v734_v1 = vpop.permute.xlu1 %733 }
  0xd3   : > { %v1579_v30 = vpop.permute.xlu0 %706 }
  0xd6   : > { %v1581_v35 = vpop.permute.xlu1 %741 }
  0xd7   : > { %v736_v31 = vpop.permute.xlu0 %735 }
  0xda   : > { %v1585_v41 = vpop.permute.xlu1 %737 }
  0xdb   : > { %v1583_v40 = vpop.permute.xlu0 %743 }
  0xdf   : > { %v1587_v43 = vpop.permute.xlu0 %739 }
 0x107   : > { %v669_v44 = vpop.permute.xlu1 %668 }
 0x108   : > { %v785_v32 = vsel %vm783_vm5, %v775_v2, %v669_v44 }
 0x109   : > { %v802_v51 = vsel %vm800_vm7, %v785_v32, %v693_v0 }
 0x10a   : > { %v818_v57 = vsel %vm817_vm8, %v802_v51, %v693_v0 }
 0x10b   : > { %v677_v33 = vpop.permute.xlu1 %676  ;;  %v671_v34 = vpop.permute.xlu0 %670 }
 0x10c   : > { %v793_v52 = vsel %vm783_vm5, %v779_v42, %v677_v33  ;;  %v787_v53 = vsel %vm783_vm5, %v776_v48, %v671_v34 }
 0x10d   : > { %v810_v61 = vsel %vm800_vm7, %v793_v52, %v701_v27  ;;  %v804_v62 = vsel %vm800_vm7, %v787_v53, %v695_v26 }
 0x10e   : > { %v822_v8 = vsel %vm817_vm8, %v810_v61, %v701_v27  ;;  %v819_v9 = vsel %vm817_vm8, %v804_v62, %v695_v26 }
 0x10f   : > { %v673_v37 = vpop.permute.xlu1 %672  ;;  %v679_v38 = vpop.permute.xlu0 %678 }
 0x110   : > { %v789_v3 = vsel %vm783_vm5, %v777_v54, %v673_v37  ;;  %v795_v4 = vsel %vm783_vm5, %v780_v55, %v679_v38  ;;  %v782_v38 = vsel %vm774_vm6, %v773_v6, %v1569_v25 }
 0x111   : > { %v806_v13 = vsel %vm800_vm7, %v789_v3, %v1573_v22  ;;  %v812_v14 = vsel %vm800_vm7, %v795_v4, %v1571_v28 }
 0x112   : > { %v820_v26 = vsel %vm817_vm8, %v806_v13, %v1573_v22  ;;  %v823_v44 = vsel %vm817_vm8, %v812_v14, %v1571_v28  ;;  %v781_v22 = vsel %vm774_vm6, %v770_v19, %v1567_v24 }
 0x113   : > { %v681_v46 = vpop.permute.xlu1 %680  ;;  %v675_v47 = vpop.permute.xlu0 %674 }
 0x114   : > { %v791_v17 = vsel %vm783_vm5, %v778_v5, %v675_v47  ;;  %v797_v28 = vsel %vm783_vm5, %v781_v22, %v681_v46 }
 0x117   : > { %v717_v56 = vpop.permute.xlu1 %716  ;;  %v683_v58 = vpop.permute.xlu0 %682 }
 0x118   : > { %v828_v63 = vsel %vm826_vm9, %v818_v57, %v717_v56  ;;  %v799_v42 = vsel %vm783_vm5, %v782_v38, %v683_v58 }
 0x119   : > { %v845_v7 = vsel %vm843_vm10, %v828_v63, %v734_v1  ;;  %v816_v47 = vsel %vm800_vm7, %v799_v42, %v1579_v30 }
 0x11a   : > { %v861_v21 = vsel %vm860_vm11, %v845_v7, %v734_v1  ;;  %v808_v1 = vsel %vm800_vm7, %v791_v17, %v1575_v29 }
 0x11b   : > { %v725_v10 = vpop.permute.xlu1 %724  ;;  %v719_v11 = vpop.permute.xlu0 %718  ;;  %v821_v2 = vsel %vm817_vm8, %v808_v1, %v1575_v29 }
 0x11c   : > { %v836_v15 = vsel %vm826_vm9, %v822_v8, %v725_v10  ;;  %v830_v16 = vsel %vm826_vm9, %v819_v9, %v719_v11 }
 0x11d   : > { %v847_v18 = vsel %vm843_vm10, %v830_v16, %v736_v31  ;;  %v853_v0 = vsel %vm843_vm10, %v836_v15, %v1581_v35 }
 0x11e   : > { %v862_v23 = vsel %vm860_vm11, %v847_v18, %v736_v31  ;;  %v865_v12 = vsel %vm860_vm11, %v853_v0, %v1581_v35  ;;  %v814_v35 = vsel %vm800_vm7, %v797_v28, %v1577_v20 }
 0x11f   : > { %v721_v27 = vpop.permute.xlu1 %720  ;;  %v727_v45 = vpop.permute.xlu0 %726  ;;  %v1133_v33 = vcombine.low %v861_v21, %v862_v23  ;;  %v824_v51 = vsel %vm817_vm8, %v814_v35, %v1577_v20 }
 0x120   : > { %v832_v31 = vsel %vm826_vm9, %v820_v26, %v721_v27  ;;  %v838_v34 = vsel %vm826_vm9, %v823_v44, %v727_v45 }
 0x121   : > { %v855_v36 = vsel %vm843_vm10, %v838_v34, %v1583_v40  ;;  %1170 = vmatprep.mubr.msk.bf16.mxu0 %vm925_vm12, %v1133_v33  ;;  %v849_v59 = vsel %vm843_vm10, %v832_v31, %v1585_v41 }
 0x122   : > { %v866_v37 = vsel %vm860_vm11, %v855_v36, %v1583_v40  ;;  %v863_v25 = vsel %vm860_vm11, %v849_v59, %v1585_v41  ;;  %v825_v41 = vsel %vm817_vm8, %v816_v47, %v1579_v30 }
 0x123   : > { %v729_v24 = vpop.permute.xlu1 %728  ;;  %v723_v39 = vpop.permute.xlu0 %722  ;;  %v1135_v32 = vcombine.low %v865_v12, %v866_v37 }
 0x124   : > { %v834_v46 = vsel %vm826_vm9, %v821_v2, %v723_v39  ;;  %v840_v52 = vsel %vm826_vm9, %v824_v51, %v729_v24 }
 0x125   : > { %v851_v40 = vsel %vm843_vm10, %v834_v46, %v1587_v43  ;;  %1174 = vmatprep.mubr.msk.bf16.mxu1 %vm925_vm12, %v1135_v32 }
 0x126   : > { %v864_v29 = vsel %vm860_vm11, %v851_v40, %v1587_v43 }
 0x127   : > { %v1134_v48 = vcombine.low %v863_v25, %v864_v29  ;;  %v746_v49 = vpop.permute.xlu1 %745  ;;  %v731_v50 = vpop.permute.xlu0 %730 }
 0x128   : > { %v857_v53 = vsel %vm843_vm10, %v840_v52, %v746_v49  ;;  %v842_v43 = vsel %vm826_vm9, %v825_v41, %v731_v50 }
 0x129   : > { %1171 = vmatmul.mubr.msk.bf16.vlgmr.msra.gmra.mrb[0].mxu0 %vm925_vm12, %v1134_v48  ;;  %v867_v56 = vsel %vm860_vm11, %v857_v53, %v746_v49 }
 0x12b   : > { %v748_v54 = vpop.permute.xlu0 %747 }
 0x12c   : > { %v859_v55 = vsel %vm843_vm10, %v842_v43, %v748_v54 }
 0x12d   : > { %v868_v57 = vsel %vm860_vm11, %v859_v55, %v748_v54 }
 0x12e   : > { %v1136_v58 = vcombine.low %v867_v56, %v868_v57 }
 0x130   : > { %1175 = vmatmul.mubr.msk.bf16.vlgmr.msra.gmra.mrb[0].mxu1 %vm925_vm12, %v1136_v58 }
 0x1fc   : > { %v1172_v20 = vpop.f32.mrb[0].mxu0 }
 0x1fd   : > { %1009 = vst [vmem:[%s326_s6 + $0x10] sm:$0xff] %v1172_v20  ;;  %v976_v30 = vpop.f32.mrb[1].mxu0 }
 0x1fe   : > { %1007 = vst [vmem:[%s326_s6] sm:$0xff] %v976_v30  ;;  %v1173_v60 = vpop.f32.mrb[2].mxu0 }
 0x1ff   : > { %1010 = vst [vmem:[%s326_s6 + $0x18] sm:$0xff] %v1173_v60  ;;  %v979_v61 = vpop.f32.mrb[3].mxu0 }
 0x200   : > { %1008 = vst [vmem:[%s326_s6 + $0x8] sm:$0xff] %v979_v61 }
 0x203   : > { %v1176_v62 = vpop.f32.mrb[0].mxu1 }
 0x204   : > { %1013 = vst [vmem:[%s326_s6 + $0x30] sm:$0xff] %v1176_v62  ;;  %v992_v63 = vpop.f32.mrb[1].mxu1 }
 0x205   : > { %1011 = vst [vmem:[%s326_s6 + $0x20] sm:$0xff] %v992_v63  ;;  %v1177_v3 = vpop.f32.mrb[2].mxu1 }
 0x206   : > { %1014 = vst [vmem:[%s326_s6 + $0x38] sm:$0xff] %v1177_v3  ;;  %v995_v4 = vpop.f32.mrb[3].mxu1 }
 0x207   : > { %1012 = vst [vmem:[%s326_s6 + $0x28] sm:$0xff] %v995_v4 }
 0x208 PF: > { %s15_s20 = sadd.s32 1, %s1247_s20   ;;  %s1708_s18 = smov %s1243_s19 }
 0x209   : > { %p12_p5 = scmp.ge.s32.totalorder %s15_s20, 4   ;;  %s1709_s19 = smov %s1711_s21 }
 0x20b   :  { %14 = sbr.rel (!%p12_p5) target bundleno = 2 (0x2), region = 73 }

</bundles_post_ra>
